<compile_context>
chip_gen: v5e
topology: v5e:2x2
jax: 0.10.0
libtpu: 0.0.40
codegen_flags: <defaults>
</compile_context>

<pallas_src>
import functools

import jax
import jax.numpy as jnp
from jax import lax
from jax.experimental import pallas as pl
from jax.experimental.pallas import tpu as pltpu

# TODO(synk): args.temperature is a CLI runtime arg in the original script.
TEMPERATURE = 0.5
PAIRWISE_EPS = 1e-6    # torch.nn.functional.pairwise_distance default eps.

_VMEM_LIMIT_BYTES = 32 * 1024 * 1024   # scoped-VMEM request (safe on v5e/v6e/v7x)
_VMEM_TARGET_BYTES = 24 * 1024 * 1024  # working-set budget tiles are sized against
_MAX_TILE_ROWS = 1024                  # measured roofline plateau is 512-1024 rows
_MIN_TILE_ROWS = 128                   # lane-aligned output blocks
_TARGET_STEPS = 8                      # >= 4 steps per TensorCore on v7x


def _round_up(x, m):
    return ((x + m - 1) // m) * m


def _pick_tile_rows(rows, k_pad, in_itemsize):
    """Row-tile size: VMEM-honest, <=1024 rows, >=8 steps at large N, even steps."""
    # 2 inputs x 2 pipeline buffers + f32/bf16 in-kernel temporaries (diff, sq,
    # hi/lo splits, possible upcasts) per lane-padded row, plus output slack.
    per_row_vmem = (2 * 2 * in_itemsize + 20) * k_pad + 64

    tile = _VMEM_TARGET_BYTES // per_row_vmem
    tile = min(tile, _MAX_TILE_ROWS)
    tile = min(tile, _round_up(pl.cdiv(rows, _TARGET_STEPS), _MIN_TILE_ROWS))
    tile = max(_MIN_TILE_ROWS, (tile // _MIN_TILE_ROWS) * _MIN_TILE_ROWS)

    # Prefer an even number of grid steps so the "parallel" axis splits evenly
    # across v7x's two TensorCores.
    steps = pl.cdiv(rows, tile)
    if steps > 1 and steps % 2 == 1:
        for cand in (tile + _MIN_TILE_ROWS, tile - _MIN_TILE_ROWS):
            if cand < _MIN_TILE_ROWS or cand > _MAX_TILE_ROWS:
                continue
            if cand > tile and cand * per_row_vmem > _VMEM_TARGET_BYTES:
                continue
            if pl.cdiv(rows, cand) % 2 == 0:
                tile = cand
                break
    return int(tile)


def _t_kernel(m_ref, x_ref, y_ref, o_ref, *, out_rows, epilogue_scale):
    # m_ref: (Gm, K) bf16 segment-indicator (DMA'd once, resident).
    # x_ref, y_ref: (tile, K) input tiles; o_ref: (G, tile) lane-dense output.
    diff = (x_ref[...].astype(jnp.float32)
            - y_ref[...].astype(jnp.float32)) + PAIRWISE_EPS
    sq = diff * diff

    # Two exact single-pass bf16 MXU matmuls on a hi/lo split of sq instead of
    # a 6-pass f32 HIGHEST dot: ~f32 accuracy at a third of the MXU pushes.
    sq_hi = sq.astype(jnp.bfloat16)
    sq_lo = (sq - sq_hi.astype(jnp.float32)).astype(jnp.bfloat16)
    m = m_ref[...]

    dims = (((1,), (1,)), ((), ()))   # contract last dims (TRANS_B style)
    acc = lax.dot_general(m, sq_hi, dims, preferred_element_type=jnp.float32)
    acc = acc + lax.dot_general(m, sq_lo, dims, preferred_element_type=jnp.float32)

    res = acc[0:out_rows, :]
    if epilogue_scale != 1.0:   # only when -1/temperature is not bf16-exact
        res = res * epilogue_scale
    o_ref[...] = res


def t_forward(x, y, *, temperature=TEMPERATURE):
    """Pallas equivalent of T.forward(x, y): x, y (N, D) -> (N,)."""
    assert x.shape == y.shape and x.ndim == 2
    n, d = x.shape
    in_dtype = x.dtype
    itemsize = jnp.dtype(in_dtype).itemsize

    # Small-D lane packing: stack G = 128/D logical rows per 128-lane row via a
    # free row-major reshape, so VMEM tiles and DMAs are fully lane-dense.
    if 0 < d < 128 and 128 % d == 0 and n % (128 // d) == 0:
        g = 128 // d
    else:
        g = 1
    rows = n // g
    k = d * g
    x2 = x.reshape(rows, k)
    y2 = y.reshape(rows, k)

    k_pad = _round_up(k, 128)
    tile = _pick_tile_rows(rows, k_pad, itemsize)
    if rows <= tile:          # single step: exact shapes, no ragged blocks at all
        tile = rows
    num_tiles = pl.cdiv(rows, tile)
    out_w = num_tiles * tile  # only the tiny f32 output is rounded up

    # Segment-indicator reduction matrix ({0,1}, exact in bf16); fold the
    # -1/temperature scale in when it is exactly representable in bf16.
    scale = -1.0 / float(temperature)
    fold = float(jnp.bfloat16(scale)) == scale
    gm = max(g, 8)
    seg = (jnp.arange(k)[None, :] // d) == jnp.arange(gm)[:, None]
    m = jnp.where(seg, scale if fold else 1.0, 0.0).astype(jnp.bfloat16)
    epilogue_scale = 1.0 if fold else scale

    kernel = functools.partial(_t_kernel, out_rows=g, epilogue_scale=epilogue_scale)

    out2d = pl.pallas_call(
        kernel,
        out_shape=jax.ShapeDtypeStruct((g, out_w), jnp.float32),
        grid_spec=pltpu.PrefetchScalarGridSpec(
            num_scalar_prefetch=0,
            grid=(num_tiles,),
            in_specs=[
                pl.BlockSpec((gm, k), lambda i: (0, 0)),    # resident, DMA'd once
                pl.BlockSpec((tile, k), lambda i: (i, 0)),
                pl.BlockSpec((tile, k), lambda i: (i, 0)),
            ],
            out_specs=pl.BlockSpec((g, tile), lambda i: (0, i)),
        ),
        compiler_params=pltpu.CompilerParams(
            dimension_semantics=("parallel",),
            vmem_limit_bytes=_VMEM_LIMIT_BYTES,
        ),
        cost_estimate=pl.CostEstimate(
            flops=int(6 * n * d + 4 * gm * k * rows),
            transcendentals=0,
            bytes_accessed=int(2 * n * d * itemsize + 4 * n + 2 * gm * k),
        ),
    )(m, x2, y2)

    # (G, rows) -> (rows, G) -> (N,) ; garbage columns from ragged last input
    # blocks live at positions >= rows and are sliced off here.
    res = out2d[:, :rows].T.reshape(-1)[:n]
    return res.astype(in_dtype)


def t_forward_ref(x, y, *, temperature=TEMPERATURE):
    # Pure-JAX reference mirroring torch.nn.functional.pairwise_distance.
    diff = (x.astype(jnp.float32) - y.astype(jnp.float32)) + PAIRWISE_EPS
    return (-jnp.sum(diff * diff, axis=-1) / temperature).astype(x.dtype)


if __name__ == "__main__":
    key = jax.random.PRNGKey(0)
    kx, ky, ka, kb = jax.random.split(key, 4)

    # Primary example: small critic-feature inputs (batch=16, feat=32),
    # exercising the small-D lane-packing path (32 | 128).
    N, D = 16, 32
    x = jax.random.normal(kx, (N, D), dtype=jnp.float32)
    y = jax.random.normal(ky, (N, D), dtype=jnp.float32)
    out = jax.block_until_ready(t_forward(x, y))
    ref = t_forward_ref(x, y)
    assert out.shape == (N,)
    assert jnp.allclose(out, ref, rtol=1e-3, atol=1e-3), "packed-path mismatch"

    # Secondary check: general (unpacked) path with a ragged row count, a
    # feature dim that does not divide 128, and a ragged multi-tile grid.
    N2, D2 = 300, 96
    a = jax.random.normal(ka, (N2, D2), dtype=jnp.float32)
    b = jax.random.normal(kb, (N2, D2), dtype=jnp.float32)
    out2 = jax.block_until_ready(t_forward(a, b))
    ref2 = t_forward_ref(a, b)
    assert out2.shape == (N2,)
    assert jnp.allclose(out2, ref2, rtol=1e-3, atol=1e-3), "general-path mismatch"

    print("KERNEL_OK")
</pallas_src>

<mosaic_0001>
module attributes {stable_mosaic.version = 11 : i64} {
  func.func @_t_kernel(%arg0: i32, %arg1: memref<8x128xbf16, #tpu.memory_space<vmem>>, %arg2: memref<4x128xf32, #tpu.memory_space<vmem>>, %arg3: memref<4x128xf32, #tpu.memory_space<vmem>>, %arg4: memref<4x4xf32, #tpu.memory_space<vmem>>) attributes {dimension_semantics = [#tpu.dimension_semantics<parallel>], iteration_bounds = array<i64: 1>, scalar_prefetch = 0 : i64, scratch_operands = 0 : i64, tpu.core_type = #tpu.core_type<tc>, window_params = [{pipeline_mode = #tpu.pipeline_mode<synchronous>, transform_indices = @transform_0, window_bounds = array<i64: 8, 128>}, {transform_indices = @transform_1, window_bounds = array<i64: 4, 128>}, {transform_indices = @transform_2, window_bounds = array<i64: 4, 128>}, {transform_indices = @transform_3, window_bounds = array<i64: 4, 4>}]} {
    %c0 = arith.constant 0 : index
    %c0_0 = arith.constant 0 : index
    %0 = vector.load %arg2[%c0, %c0_0] : memref<4x128xf32, #tpu.memory_space<vmem>>, vector<4x128xf32>
    %c0_1 = arith.constant 0 : index
    %c0_2 = arith.constant 0 : index
    %1 = vector.load %arg3[%c0_1, %c0_2] : memref<4x128xf32, #tpu.memory_space<vmem>>, vector<4x128xf32>
    %2 = arith.subf %0, %1 : vector<4x128xf32>
    %cst = arith.constant 9.99999997E-7 : f32
    %3 = vector.broadcast %cst : f32 to vector<4x128xf32>
    %4 = arith.addf %2, %3 : vector<4x128xf32>
    %5 = arith.mulf %4, %4 : vector<4x128xf32>
    %6 = arith.truncf %5 : vector<4x128xf32> to vector<4x128xbf16>
    %7 = arith.extf %6 : vector<4x128xbf16> to vector<4x128xf32>
    %8 = arith.subf %5, %7 : vector<4x128xf32>
    %9 = arith.truncf %8 : vector<4x128xf32> to vector<4x128xbf16>
    %c0_3 = arith.constant 0 : index
    %c0_4 = arith.constant 0 : index
    %10 = vector.load %arg1[%c0_3, %c0_4] : memref<8x128xbf16, #tpu.memory_space<vmem>>, vector<8x128xbf16>
    %cst_5 = arith.constant dense<0.000000e+00> : vector<8x4xf32>
    %11 = tpu.matmul %10, %6, %cst_5 {dimension_numbers = #tpu.dot_dimension_numbers<[1], [1], [0], [0], [0, 0, 1, 0], [], []>} : vector<8x128xbf16>, vector<4x128xbf16>, vector<8x4xf32> -> vector<8x4xf32>
    %cst_6 = arith.constant dense<0.000000e+00> : vector<8x4xf32>
    %12 = tpu.matmul %10, %9, %cst_6 {dimension_numbers = #tpu.dot_dimension_numbers<[1], [1], [0], [0], [0, 0, 1, 0], [], []>} : vector<8x128xbf16>, vector<4x128xbf16>, vector<8x4xf32> -> vector<8x4xf32>
    %13 = arith.addf %11, %12 : vector<8x4xf32>
    %14 = vector.extract_strided_slice %13 {offsets = [0, 0], sizes = [4, 4], strides = [1, 1]} : vector<8x4xf32> to vector<4x4xf32>
    %c0_7 = arith.constant 0 : index
    %c0_8 = arith.constant 0 : index
    %15 = vector.load %arg4[%c0_7, %c0_8] : memref<4x4xf32, #tpu.memory_space<vmem>>, vector<4x4xf32>
    tpu.vector_store %arg4[%c0_7, %c0_8], %14 {strides = array<i32>} : memref<4x4xf32, #tpu.memory_space<vmem>>, vector<4x4xf32>,
    return
  }
  func.func @transform_0(%arg0: i32) -> (i32, i32) {
    %c0_i32 = arith.constant 0 : i32
    %c0_i32_0 = arith.constant 0 : i32
    %c0_i32_1 = arith.constant 0 : i32
    return %c0_i32, %c0_i32_0 : i32, i32
  }
  func.func @transform_1(%arg0: i32) -> (i32, i32) {
    %c0_i32 = arith.constant 0 : i32
    %c0_i32_0 = arith.constant 0 : i32
    return %arg0, %c0_i32 : i32, i32
  }
  func.func @transform_2(%arg0: i32) -> (i32, i32) {
    %c0_i32 = arith.constant 0 : i32
    %c0_i32_0 = arith.constant 0 : i32
    return %arg0, %c0_i32 : i32, i32
  }
  func.func @transform_3(%arg0: i32) -> (i32, i32) {
    %c0_i32 = arith.constant 0 : i32
    %c0_i32_0 = arith.constant 0 : i32
    return %c0_i32, %arg0 : i32, i32
  }
}

</mosaic_0001>

<bundles_post_ra>
// kernel: tpu_custom_call.1
= control target key start
LH: loop header
LB: loop body
LE: loop exit
PB: predicated region body
PF: predicated region fallthrough
CT: control target
= control target key end

     0   :  { %8 = vsyncpa [#allocation3], 0  ;;  %s255_s0 = inlined_call_operand.hbm [shape: bf16[8,128], index: 0, kind: input, shape index: {}]   ;;  %s256_s1 = inlined_call_operand.hbm [shape: f32[4,128], index: 1, kind: input, shape index: {}]   ;;  %s257_s2 = inlined_call_operand.hbm [shape: f32[4,128], index: 2, kind: input, shape index: {}]   ;;  %s258_s3 = inlined_call_operand.hbm [shape: f32[4,4], index: 3, kind: output, shape index: {}]  }
   0x1   :  { %9 = vsyncpa [#allocation6], 0  ;;  %s27_s14 = sshll.u32 %s256_s1, 4  ;;  %s28_s14 = int_to_ptr.hbm [resolvable:$true] %s27_s14 }
   0x2   :  { %10 = vsyncpa [#allocation4], 0  ;;  %s219_s15 = smov [#allocation5]   ;;  %s16_s19 = sshll.u32 %s255_s0, 4  ;;  %s17_s19 = int_to_ptr.hbm [resolvable:$true] %s16_s19 }
   0x3   :  { %s29_s16 = sshll.u32 %s219_s15, 4  ;;  %s220_s20 = smov [#allocation2]   ;;  %s30_s16 = int_to_ptr.vmem [resolvable:$true] %s29_s16 }
   0x4   :  { %32 = dma.hbm_to_vmem [thread:$0]  %s28_s14, 64, %s30_s16, [#allocation6]  }
   0x5   :  { %s18_s21 = sshll.u32 %s220_s20, 4  ;;  %s38_s24 = sshll.u32 %s257_s2, 4  ;;  %s19_s21 = int_to_ptr.vmem [resolvable:$true] %s18_s21  ;;  %s39_s24 = int_to_ptr.hbm [resolvable:$true] %s38_s24 }
   0x6   :  { %21 = dma.hbm_to_vmem [thread:$0]  %s17_s19, 64, %s19_s21, [#allocation3]  }
   0x7   :  { %s221_s1 = smov [#allocation7]  }
   0x8   :  { %s40_s25 = sshll.u32 %s221_s1, 4  ;;  %s41_s25 = int_to_ptr.vmem [resolvable:$true] %s40_s25 }
   0x9   :  { %43 = dma.hbm_to_vmem [thread:$0]  %s39_s24, 64, %s41_s25, [#allocation6]  }
   0xa   :  { %213 = dma.done.wait [#allocation3], 64  }
   0xb   :  { %214 = vsyncadd [#allocation3], 4294967232 }
   0xc   :  { %215 = dma.done.wait [#allocation6], 128  }
   0xd   :  { %216 = vsyncadd [#allocation6], 4294967168  ;;  %v57_v0 = vld [vmem:[#allocation5] sm:$0xf]  ;;  %v58_v1 = vld [vmem:[#allocation7] sm:$0xf] }
   0xe   :  { %v59_v2 = vsub.f32 %v57_v0, %v58_v1  ;;  %v66_v9 = vld [vmem:[#allocation2] sm:$0xf]  ;;  %s222_s0 = smov [#allocation8]   ;;  %s102_s28 = sshll.u32 %s258_s3, 4  ;;  %vm93_vm0 = vcmask 27648   ;;  %s103_s28 = int_to_ptr.hbm [resolvable:$true] %s102_s28 }
   0xf   :  { %s100_s2 = sshll.u32 %s222_s0, 4  ;;  %s101_s2 = int_to_ptr.vmem [resolvable:$true] %s100_s2 }
  0x10   :  { %v60_v3 = vadd.f32 1e-06, %v59_v2 }
  0x12   :  { %v61_v4 = vmul.f32 %v60_v3, %v60_v3 }
  0x14   :  { %v62_v5 = vpack.c.bf16 %v61_v4, %v61_v4 }
  0x16   :  { %87 = vmatpush.bf16.xpose.msra.mxu1 %v62_v5  ;;  %v63_v6 = vunpack.c.l.bf16 %v62_v5 }
  0x18   :  { %v64_v7 = vsub.f32 %v61_v4, %v63_v6 }
  0x1a   :  { %v65_v8 = vpack.c.bf16 %v64_v7, %v64_v7 }
  0x1c   :  { %74 = vmatpush.bf16.xpose.msra.mxu0 %v65_v8 }
  0x1d   :  { %88 = vmatmul.bf16.vlgmr.msra.gmra.mxu1 %v66_v9 }
  0x23   :  { %75 = vmatmul.bf16.vlgmr.msra.gmra.mxu0 %v66_v9 }
  0x9a   :  { %v89_v10 = vpop.f32.mrf.mxu1 }
  0xa0   :  { %v76_v11 = vpop.f32.mrf.mxu0 }
  0xa1   :  { %v90_v12 = vadd.f32 %v89_v10, %v76_v11 }
  0xa2   :  { %v91_v13 = vpop.f32.mrf.mxu1 }
  0xa3   :  { %94 = vst.msk [vmem:[#allocation8] sm:$0xf] %vm93_vm0, %v90_v12 }
  0xa4   :  { %105 = dma.vmem_to_hbm [thread:$0]  %s101_s2, 64, %s103_s28, [#allocation4]  }
  0xa8   :  { %v78_v14 = vpop.f32.mrf.mxu0 }
  0xa9   :  { %217 = dma.done.wait [#allocation4], 64  }
  0xaa   :  { %218 = vsyncadd [#allocation4], 4294967232 }
  0xab   :  { %110 = vsyncpa [#allocation3], 1 }
  0xac   :  { %111 = vsyncpa [#allocation6], 1 }
  0xad   :  { %112 = vsyncpa [#allocation4], 1 }

</bundles_post_ra>
